<compile_context>
chip_gen: v6e
topology: v6e:2x2x1
jax: 0.10.0
libtpu: 0.0.40
codegen_flags: <defaults>
</compile_context>

<pallas_src>
import functools

import jax
import jax.numpy as jnp
from jax.experimental import pallas as pl
from jax.experimental.pallas import tpu as pltpu


def _actor_critic_kernel(x_ref, w1_ref, b1_ref, w2_ref, b2_ref, wh_ref, bh_ref,
                         out_ref):
    # shared layer 1: Linear + ReLU   (f32 accumulation on the MXU)
    h = jnp.dot(x_ref[...], w1_ref[...], preferred_element_type=jnp.float32)
    h = jnp.maximum(h + b1_ref[...], 0.0)
    # shared layer 2: Linear + ReLU
    h = h.astype(w2_ref.dtype)
    h = jnp.dot(h, w2_ref[...], preferred_element_type=jnp.float32)
    h = jnp.maximum(h + b2_ref[...], 0.0)
    # fused policy|value head: single lane-dense matmul + single lane-dense store
    h = h.astype(wh_ref.dtype)
    out = jnp.dot(h, wh_ref[...], preferred_element_type=jnp.float32) + bh_ref[...]
    out_ref[...] = out.astype(out_ref.dtype)


def _round_up(n, m):
    return ((n + m - 1) // m) * m


@functools.partial(jax.jit, static_argnames=("tb", "compute_dtype"))
def actor_critic_ff(x, params, *, tb=128, compute_dtype=jnp.float32):
    """Forward pass of ActorCriticFF.

    x: [B, state_size] (or [state_size]).
    params: (w1, b1, w2, b2, wp, bp, wv, bv) with weights stored as [in, out]
            (PyTorch W.T) and biases as [1, out].
    Returns (policy_logits [B, action_size], value [B, 1]) in float32.
    """
    if x.ndim == 1:
        x = x[None, :]
    w1, b1, w2, b2, wp, bp, wv, bv = params
    B, S = x.shape
    H = w1.shape[1]
    A = wp.shape[1]

    # ---- fuse the two heads: [H, A] | [H, 1] -> [H, A+1] -------------------
    wh = jnp.concatenate([wp, wv], axis=1)            # [H, A+1]
    bh = jnp.concatenate([bp, bv], axis=1)            # [1, A+1]

    # ---- pad feature dims to 128 lanes, batch to a multiple of TB ----------
    S_pad = _round_up(S, 128)
    H_pad = _round_up(H, 128)
    O_pad = _round_up(A + 1, 128)
    B_pad = _round_up(B, tb)

    cd = compute_dtype
    xp = jnp.zeros((B_pad, S_pad), cd).at[:B, :S].set(x.astype(cd))
    w1p = jnp.zeros((S_pad, H_pad), cd).at[:S, :H].set(w1.astype(cd))
    b1p = jnp.zeros((1, H_pad), jnp.float32).at[:, :H].set(b1.astype(jnp.float32))
    w2p = jnp.zeros((H_pad, H_pad), cd).at[:H, :H].set(w2.astype(cd))
    b2p = jnp.zeros((1, H_pad), jnp.float32).at[:, :H].set(b2.astype(jnp.float32))
    whp = jnp.zeros((H_pad, O_pad), cd).at[:H, :A + 1].set(wh.astype(cd))
    bhp = jnp.zeros((1, O_pad), jnp.float32).at[:, :A + 1].set(bh.astype(jnp.float32))

    grid = (B_pad // tb,)
    resident = lambda i: (0, 0)   # weights/biases: same block every step (VMEM-resident)

    out = pl.pallas_call(
        _actor_critic_kernel,
        out_shape=jax.ShapeDtypeStruct((B_pad, O_pad), jnp.float32),
        grid=grid,
        in_specs=[
            pl.BlockSpec((tb, S_pad), lambda i: (i, 0)),      # x tile
            pl.BlockSpec((S_pad, H_pad), resident),           # W1
            pl.BlockSpec((1, H_pad), resident),               # b1
            pl.BlockSpec((H_pad, H_pad), resident),           # W2
            pl.BlockSpec((1, H_pad), resident),               # b2
            pl.BlockSpec((H_pad, O_pad), resident),           # fused head W
            pl.BlockSpec((1, O_pad), resident),               # fused head b
        ],
        out_specs=pl.BlockSpec((tb, O_pad), lambda i: (i, 0)),
        compiler_params=pltpu.CompilerParams(
            dimension_semantics=("parallel",)),                # shard batch tiles on v7x's 2 TCs
    )(xp, w1p, b1p, w2p, b2p, whp, bhp)

    policy = out[:B, :A]
    value = out[:B, A:A + 1]
    return policy, value


def init_params(key, state_size, action_size, hidden_size=256):
    """Deterministic init mimicking nn.Linear (uniform +-1/sqrt(fan_in)).
    Weights are stored transposed: [in, out]; biases as [1, out]."""
    def linear(key, fan_in, fan_out):
        kw, kb = jax.random.split(key)
        bound = 1.0 / jnp.sqrt(jnp.float32(fan_in))
        w = jax.random.uniform(kw, (fan_in, fan_out), jnp.float32,
                               minval=-bound, maxval=bound)
        b = jax.random.uniform(kb, (1, fan_out), jnp.float32,
                               minval=-bound, maxval=bound)
        return w, b

    k1, k2, k3, k4 = jax.random.split(key, 4)
    w1, b1 = linear(k1, state_size, hidden_size)
    w2, b2 = linear(k2, hidden_size, hidden_size)
    wp, bp = linear(k3, hidden_size, action_size)
    wv, bv = linear(k4, hidden_size, 1)
    return (w1, b1, w2, b2, wp, bp, wv, bv)


def reference_forward(x, params):
    """Pure-JAX reference for correctness check."""
    if x.ndim == 1:
        x = x[None, :]
    w1, b1, w2, b2, wp, bp, wv, bv = params
    h = jnp.maximum(x @ w1 + b1, 0.0)
    h = jnp.maximum(h @ w2 + b2, 0.0)
    return h @ wp + bp, h @ wv + bv


if __name__ == "__main__":
    key = jax.random.PRNGKey(0)
    k_params, k_x = jax.random.split(key)

    batch = 2
    state_size = 16
    action_size = 8
    hidden_size = 32

    params = init_params(k_params, state_size, action_size, hidden_size)
    x = jax.random.normal(k_x, (batch, state_size), jnp.float32)

    ref_policy, ref_value = reference_forward(x, params)

    # f32 path (exact against the reference)
    policy, value = actor_critic_ff(x, params, compute_dtype=jnp.float32)
    jax.block_until_ready((policy, value))
    assert policy.shape == (batch, action_size)
    assert value.shape == (batch, 1)
    assert jnp.allclose(policy, ref_policy, atol=1e-5, rtol=1e-5)
    assert jnp.allclose(value, ref_value, atol=1e-5, rtol=1e-5)

    # bf16 operand path (v6e/v7x MXU-friendly); looser tolerance for bf16 inputs.
    policy_bf16, value_bf16 = actor_critic_ff(x, params, compute_dtype=jnp.bfloat16)
    jax.block_until_ready((policy_bf16, value_bf16))
    assert jnp.allclose(policy_bf16, ref_policy, atol=1e-1, rtol=1e-1)
    assert jnp.allclose(value_bf16, ref_value, atol=1e-1, rtol=1e-1)

    print("KERNEL_OK")
</pallas_src>

<mosaic_0001>
module attributes {stable_mosaic.version = 11 : i64} {
  func.func @_actor_critic_kernel(%arg0: i32, %arg1: memref<128x128xf32, #tpu.memory_space<vmem>>, %arg2: memref<128x128xf32, #tpu.memory_space<vmem>>, %arg3: memref<1x128xf32, #tpu.memory_space<vmem>>, %arg4: memref<128x128xf32, #tpu.memory_space<vmem>>, %arg5: memref<1x128xf32, #tpu.memory_space<vmem>>, %arg6: memref<128x128xf32, #tpu.memory_space<vmem>>, %arg7: memref<1x128xf32, #tpu.memory_space<vmem>>, %arg8: memref<128x128xf32, #tpu.memory_space<vmem>>) attributes {dimension_semantics = [#tpu.dimension_semantics<parallel>], iteration_bounds = array<i64: 1>, scalar_prefetch = 0 : i64, scratch_operands = 0 : i64, tpu.core_type = #tpu.core_type<tc>, window_params = [{transform_indices = @transform_0, window_bounds = array<i64: 128, 128>}, {pipeline_mode = #tpu.pipeline_mode<synchronous>, transform_indices = @transform_1, window_bounds = array<i64: 128, 128>}, {pipeline_mode = #tpu.pipeline_mode<synchronous>, transform_indices = @transform_2, window_bounds = array<i64: 1, 128>}, {pipeline_mode = #tpu.pipeline_mode<synchronous>, transform_indices = @transform_3, window_bounds = array<i64: 128, 128>}, {pipeline_mode = #tpu.pipeline_mode<synchronous>, transform_indices = @transform_4, window_bounds = array<i64: 1, 128>}, {pipeline_mode = #tpu.pipeline_mode<synchronous>, transform_indices = @transform_5, window_bounds = array<i64: 128, 128>}, {pipeline_mode = #tpu.pipeline_mode<synchronous>, transform_indices = @transform_6, window_bounds = array<i64: 1, 128>}, {transform_indices = @transform_7, window_bounds = array<i64: 128, 128>}]} {
    %c0 = arith.constant 0 : index
    %c0_0 = arith.constant 0 : index
    %0 = vector.load %arg1[%c0, %c0_0] : memref<128x128xf32, #tpu.memory_space<vmem>>, vector<128x128xf32>
    %c0_1 = arith.constant 0 : index
    %c0_2 = arith.constant 0 : index
    %1 = vector.load %arg2[%c0_1, %c0_2] : memref<128x128xf32, #tpu.memory_space<vmem>>, vector<128x128xf32>
    %cst = arith.constant dense<0.000000e+00> : vector<128x128xf32>
    %2 = tpu.matmul %0, %1, %cst {dimension_numbers = #tpu.dot_dimension_numbers<[1], [0], [0], [1], [0, 0, 1, 1], [], []>} : vector<128x128xf32>, vector<128x128xf32>, vector<128x128xf32> -> vector<128x128xf32>
    %c0_3 = arith.constant 0 : index
    %c0_4 = arith.constant 0 : index
    %3 = vector.load %arg3[%c0_3, %c0_4] : memref<1x128xf32, #tpu.memory_space<vmem>>, vector<1x128xf32>
    %4 = vector.broadcast %3 : vector<1x128xf32> to vector<128x128xf32>
    %5 = arith.addf %2, %4 : vector<128x128xf32>
    %cst_5 = arith.constant 0.000000e+00 : f32
    %6 = vector.broadcast %cst_5 : f32 to vector<128x128xf32>
    %7 = arith.maximumf %5, %6 : vector<128x128xf32>
    %c0_6 = arith.constant 0 : index
    %c0_7 = arith.constant 0 : index
    %8 = vector.load %arg4[%c0_6, %c0_7] : memref<128x128xf32, #tpu.memory_space<vmem>>, vector<128x128xf32>
    %cst_8 = arith.constant dense<0.000000e+00> : vector<128x128xf32>
    %9 = tpu.matmul %7, %8, %cst_8 {dimension_numbers = #tpu.dot_dimension_numbers<[1], [0], [0], [1], [0, 0, 1, 1], [], []>} : vector<128x128xf32>, vector<128x128xf32>, vector<128x128xf32> -> vector<128x128xf32>
    %c0_9 = arith.constant 0 : index
    %c0_10 = arith.constant 0 : index
    %10 = vector.load %arg5[%c0_9, %c0_10] : memref<1x128xf32, #tpu.memory_space<vmem>>, vector<1x128xf32>
    %11 = vector.broadcast %10 : vector<1x128xf32> to vector<128x128xf32>
    %12 = arith.addf %9, %11 : vector<128x128xf32>
    %cst_11 = arith.constant 0.000000e+00 : f32
    %13 = vector.broadcast %cst_11 : f32 to vector<128x128xf32>
    %14 = arith.maximumf %12, %13 : vector<128x128xf32>
    %c0_12 = arith.constant 0 : index
    %c0_13 = arith.constant 0 : index
    %15 = vector.load %arg6[%c0_12, %c0_13] : memref<128x128xf32, #tpu.memory_space<vmem>>, vector<128x128xf32>
    %cst_14 = arith.constant dense<0.000000e+00> : vector<128x128xf32>
    %16 = tpu.matmul %14, %15, %cst_14 {dimension_numbers = #tpu.dot_dimension_numbers<[1], [0], [0], [1], [0, 0, 1, 1], [], []>} : vector<128x128xf32>, vector<128x128xf32>, vector<128x128xf32> -> vector<128x128xf32>
    %c0_15 = arith.constant 0 : index
    %c0_16 = arith.constant 0 : index
    %17 = vector.load %arg7[%c0_15, %c0_16] : memref<1x128xf32, #tpu.memory_space<vmem>>, vector<1x128xf32>
    %18 = vector.broadcast %17 : vector<1x128xf32> to vector<128x128xf32>
    %19 = arith.addf %16, %18 : vector<128x128xf32>
    %c0_17 = arith.constant 0 : index
    %c0_18 = arith.constant 0 : index
    %20 = vector.load %arg8[%c0_17, %c0_18] : memref<128x128xf32, #tpu.memory_space<vmem>>, vector<128x128xf32>
    tpu.vector_store %arg8[%c0_17, %c0_18], %19 {strides = array<i32>} : memref<128x128xf32, #tpu.memory_space<vmem>>, vector<128x128xf32>,
    return
  }
  func.func @transform_0(%arg0: i32) -> (i32, i32) {
    %c0_i32 = arith.constant 0 : i32
    %c0_i32_0 = arith.constant 0 : i32
    return %arg0, %c0_i32 : i32, i32
  }
  func.func @transform_1(%arg0: i32) -> (i32, i32) {
    %c0_i32 = arith.constant 0 : i32
    %c0_i32_0 = arith.constant 0 : i32
    %c0_i32_1 = arith.constant 0 : i32
    return %c0_i32, %c0_i32_0 : i32, i32
  }
  func.func @transform_2(%arg0: i32) -> (i32, i32) {
    %c0_i32 = arith.constant 0 : i32
    %c0_i32_0 = arith.constant 0 : i32
    %c0_i32_1 = arith.constant 0 : i32
    return %c0_i32, %c0_i32_0 : i32, i32
  }
  func.func @transform_3(%arg0: i32) -> (i32, i32) {
    %c0_i32 = arith.constant 0 : i32
    %c0_i32_0 = arith.constant 0 : i32
    %c0_i32_1 = arith.constant 0 : i32
    return %c0_i32, %c0_i32_0 : i32, i32
  }
  func.func @transform_4(%arg0: i32) -> (i32, i32) {
    %c0_i32 = arith.constant 0 : i32
    %c0_i32_0 = arith.constant 0 : i32
    %c0_i32_1 = arith.constant 0 : i32
    return %c0_i32, %c0_i32_0 : i32, i32
  }
  func.func @transform_5(%arg0: i32) -> (i32, i32) {
    %c0_i32 = arith.constant 0 : i32
    %c0_i32_0 = arith.constant 0 : i32
    %c0_i32_1 = arith.constant 0 : i32
    return %c0_i32, %c0_i32_0 : i32, i32
  }
  func.func @transform_6(%arg0: i32) -> (i32, i32) {
    %c0_i32 = arith.constant 0 : i32
    %c0_i32_0 = arith.constant 0 : i32
    %c0_i32_1 = arith.constant 0 : i32
    return %c0_i32, %c0_i32_0 : i32, i32
  }
  func.func @transform_7(%arg0: i32) -> (i32, i32) {
    %c0_i32 = arith.constant 0 : i32
    %c0_i32_0 = arith.constant 0 : i32
    return %arg0, %c0_i32 : i32, i32
  }
}

</mosaic_0001>

<bundles_post_ra>
// kernel: actor_critic_ff.1
= control target key start
LH: loop header
LB: loop body
LE: loop exit
PB: predicated region body
PF: predicated region fallthrough
CT: control target
= control target key end

     0   :  { %s1258_s1 = inlined_call_operand.vmem [shape: f32[128,128], index: 1, kind: input, shape index: {}]   ;;  %s1259_s0 = inlined_call_operand.vmem [shape: f32[128,128], index: 0, kind: input, shape index: {}]   ;;  %s1260_s3 = inlined_call_operand.vmem [shape: f32[128,128], index: 3, kind: input, shape index: {}]   ;;  %s1261_s5 = inlined_call_operand.vmem [shape: f32[128,128], index: 5, kind: input, shape index: {}]   ;;  %s1262_s2 = inlined_call_operand.vmem [shape: f32[1,128], index: 2, kind: input, shape index: {}]   ;;  %s1263_s4 = inlined_call_operand.vmem [shape: f32[1,128], index: 4, kind: input, shape index: {}]   ;;  %s1264_s6 = inlined_call_operand.vmem [shape: f32[1,128], index: 6, kind: input, shape index: {}]   ;;  %s1265_s7 = inlined_call_operand.vmem [shape: f32[128,128], index: 7, kind: output, shape index: {}]  }
   0x1   :  { %v57_v0 = vld [vmem:[%s1258_s1 + $0x78] sm:$0xff]  ;;  %v56_v1 = vld [vmem:[%s1258_s1 + $0x70] sm:$0xff]  ;;  %v55_v2 = vld [vmem:[%s1258_s1 + $0x68] sm:$0xff] }
   0x2   :  { %697 = vmatprep.subr.mxu0 %v57_v0  ;;  %v54_v3 = vld [vmem:[%s1258_s1 + $0x60] sm:$0xff]  ;;  %v53_v5 = vld [vmem:[%s1258_s1 + $0x58] sm:$0xff]  ;;  %v52_v6 = vld [vmem:[%s1258_s1 + $0x50] sm:$0xff] }
   0x3   :  { %698 = vmatpush3.msra.mxu0 %v57_v0  ;;  %v26_v4 = vld [vmem:[%s1259_s0] sm:$0xff]  ;;  %v51_v7 = vld [vmem:[%s1258_s1 + $0x48] sm:$0xff]  ;;  %v241_v8 = vld [vmem:[%s1260_s3 + $0x78] sm:$0xff] }
   0x4   :  { %699 = vmatprep.subr.mxu0 %v56_v1  ;;  %729 = vmatprep.mubr.f32.mxu0 %v26_v4  ;;  %v240_v9 = vld [vmem:[%s1260_s3 + $0x70] sm:$0xff]  ;;  %v50_v10 = vld [vmem:[%s1258_s1 + $0x40] sm:$0xff]  ;;  %v239_v11 = vld [vmem:[%s1260_s3 + $0x68] sm:$0xff] }
   0x5   :  { %700 = vmatpush3.msra.mxu0 %v56_v1  ;;  %753 = vmatprep.subr.mxu1 %v241_v8  ;;  %v49_v12 = vld [vmem:[%s1258_s1 + $0x38] sm:$0xff]  ;;  %v238_v13 = vld [vmem:[%s1260_s3 + $0x60] sm:$0xff]  ;;  %v48_v14 = vld [vmem:[%s1258_s1 + $0x30] sm:$0xff] }
   0x6   :  { %701 = vmatprep.subr.mxu0 %v55_v2  ;;  %754 = vmatpush3.msra.mxu1 %v241_v8  ;;  %v237_v15 = vld [vmem:[%s1260_s3 + $0x58] sm:$0xff]  ;;  %v47_v16 = vld [vmem:[%s1258_s1 + $0x28] sm:$0xff]  ;;  %v236_v17 = vld [vmem:[%s1260_s3 + $0x50] sm:$0xff] }
   0x7   :  { %702 = vmatpush3.msra.mxu0 %v55_v2  ;;  %755 = vmatprep.subr.mxu1 %v240_v9  ;;  %v46_v18 = vld [vmem:[%s1258_s1 + $0x20] sm:$0xff]  ;;  %v235_v19 = vld [vmem:[%s1260_s3 + $0x48] sm:$0xff]  ;;  %v45_v20 = vld [vmem:[%s1258_s1 + $0x18] sm:$0xff] }
   0x8   :  { %703 = vmatprep.subr.mxu0 %v54_v3  ;;  %756 = vmatpush3.msra.mxu1 %v240_v9  ;;  %v234_v21 = vld [vmem:[%s1260_s3 + $0x40] sm:$0xff]  ;;  %v44_v22 = vld [vmem:[%s1258_s1 + $0x10] sm:$0xff]  ;;  %v233_v23 = vld [vmem:[%s1260_s3 + $0x38] sm:$0xff] }
   0x9   :  { %704 = vmatpush3.msra.mxu0 %v54_v3  ;;  %757 = vmatprep.subr.mxu1 %v239_v11  ;;  %v43_v24 = vld [vmem:[%s1258_s1 + $0x8] sm:$0xff]  ;;  %v232_v25 = vld [vmem:[%s1260_s3 + $0x30] sm:$0xff]  ;;  %v42_v26 = vld [vmem:[%s1258_s1] sm:$0xff] }
   0xa   :  { %705 = vmatprep.subr.mxu0 %v53_v5  ;;  %758 = vmatpush3.msra.mxu1 %v239_v11  ;;  %v231_v27 = vld [vmem:[%s1260_s3 + $0x28] sm:$0xff]  ;;  %v230_v29 = vld [vmem:[%s1260_s3 + $0x20] sm:$0xff]  ;;  %v28_v30 = vld [vmem:[%s1259_s0 + $0x10] sm:$0xff] }
   0xb   :  { %706 = vmatpush3.msra.mxu0 %v53_v5  ;;  %759 = vmatprep.subr.mxu1 %v238_v13  ;;  %v27_v28 = vld [vmem:[%s1259_s0 + $0x8] sm:$0xff]  ;;  %v29_v31 = vld [vmem:[%s1259_s0 + $0x18] sm:$0xff]  ;;  %v30_v32 = vld [vmem:[%s1259_s0 + $0x20] sm:$0xff] }
   0xc   :  { %707 = vmatprep.subr.mxu0 %v52_v6  ;;  %760 = vmatpush3.msra.mxu1 %v238_v13  ;;  %v31_v33 = vld [vmem:[%s1259_s0 + $0x28] sm:$0xff]  ;;  %v32_v34 = vld [vmem:[%s1259_s0 + $0x30] sm:$0xff]  ;;  %v33_v35 = vld [vmem:[%s1259_s0 + $0x38] sm:$0xff] }
   0xd   :  { %708 = vmatpush3.msra.mxu0 %v52_v6  ;;  %761 = vmatprep.subr.mxu1 %v237_v15  ;;  %v34_v36 = vld [vmem:[%s1259_s0 + $0x40] sm:$0xff]  ;;  %v35_v37 = vld [vmem:[%s1259_s0 + $0x48] sm:$0xff]  ;;  %v36_v38 = vld [vmem:[%s1259_s0 + $0x50] sm:$0xff] }
   0xe   :  { %709 = vmatprep.subr.mxu0 %v51_v7  ;;  %762 = vmatpush3.msra.mxu1 %v237_v15  ;;  %v37_v39 = vld [vmem:[%s1259_s0 + $0x58] sm:$0xff]  ;;  %v38_v40 = vld [vmem:[%s1259_s0 + $0x60] sm:$0xff]  ;;  %v39_v41 = vld [vmem:[%s1259_s0 + $0x68] sm:$0xff] }
   0xf   :  { %710 = vmatpush3.msra.mxu0 %v51_v7  ;;  %763 = vmatprep.subr.mxu1 %v236_v17  ;;  %v40_v42 = vld [vmem:[%s1259_s0 + $0x70] sm:$0xff]  ;;  %v41_v43 = vld [vmem:[%s1259_s0 + $0x78] sm:$0xff]  ;;  %v227_v46 = vld [vmem:[%s1260_s3 + $0x8] sm:$0xff] }
  0x10   :  { %711 = vmatprep.subr.mxu0 %v50_v10  ;;  %764 = vmatpush3.msra.mxu1 %v236_v17  ;;  %v229_v44 = vld [vmem:[%s1260_s3 + $0x18] sm:$0xff]  ;;  %v228_v45 = vld [vmem:[%s1260_s3 + $0x10] sm:$0xff]  ;;  %v226_v47 = vld [vmem:[%s1260_s3] sm:$0xff] }
  0x11   :  { %712 = vmatpush3.msra.mxu0 %v50_v10  ;;  %765 = vmatprep.subr.mxu1 %v235_v19  ;;  %v425_v48 = vld [vmem:[%s1261_s5 + $0x78] sm:$0xff]  ;;  %v424_v49 = vld [vmem:[%s1261_s5 + $0x70] sm:$0xff]  ;;  %v423_v50 = vld [vmem:[%s1261_s5 + $0x68] sm:$0xff] }
  0x12   :  { %713 = vmatprep.subr.mxu0 %v49_v12  ;;  %766 = vmatpush3.msra.mxu1 %v235_v19  ;;  %v1093_v51 = vld [vmem:[%s1261_s5 + $0x60] sm:$0xff]  ;;  %v1098_v52 = vld [vmem:[%s1261_s5 + $0x58] sm:$0xff]  ;;  %v1105_v53 = vld [vmem:[%s1261_s5 + $0x50] sm:$0xff] }
  0x13   :  { %714 = vmatpush3.msra.mxu0 %v49_v12  ;;  %767 = vmatprep.subr.mxu1 %v234_v21  ;;  %v1112_v54 = vld [vmem:[%s1261_s5 + $0x48] sm:$0xff]  ;;  %v1119_v55 = vld [vmem:[%s1261_s5 + $0x40] sm:$0xff]  ;;  %v1126_v56 = vld [vmem:[%s1261_s5 + $0x38] sm:$0xff] }
  0x14   :  { %715 = vmatprep.subr.mxu0 %v48_v14  ;;  %768 = vmatpush3.msra.mxu1 %v234_v21  ;;  %v1133_v57 = vld [vmem:[%s1261_s5 + $0x30] sm:$0xff]  ;;  %v1140_v58 = vld [vmem:[%s1261_s5 + $0x28] sm:$0xff]  ;;  %v1147_v59 = vld [vmem:[%s1261_s5 + $0x20] sm:$0xff] }
  0x15   :  { %716 = vmatpush3.msra.mxu0 %v48_v14  ;;  %769 = vmatprep.subr.mxu1 %v233_v23  ;;  %v1156_v60 = vld [vmem:[%s1262_s2] ss:$0 sm:$0xff] }
  0x16   :  { %717 = vmatprep.subr.mxu0 %v47_v16  ;;  %770 = vmatpush3.msra.mxu1 %v233_v23 }
  0x17   :  { %718 = vmatpush3.msra.mxu0 %v47_v16  ;;  %771 = vmatprep.subr.mxu1 %v232_v25 }
  0x18   :  { %719 = vmatprep.subr.mxu0 %v46_v18  ;;  %772 = vmatpush3.msra.mxu1 %v232_v25 }
  0x19   :  { %720 = vmatpush3.msra.mxu0 %v46_v18  ;;  %773 = vmatprep.subr.mxu1 %v231_v27 }
  0x1a   :  { %721 = vmatprep.subr.mxu0 %v45_v20  ;;  %774 = vmatpush3.msra.mxu1 %v231_v27 }
  0x1b   :  { %722 = vmatpush3.msra.mxu0 %v45_v20  ;;  %775 = vmatprep.subr.mxu1 %v230_v29 }
  0x1c   :  { %723 = vmatprep.subr.mxu0 %v44_v22  ;;  %776 = vmatpush3.msra.mxu1 %v230_v29 }
  0x1d   :  { %724 = vmatpush3.msra.mxu0 %v44_v22  ;;  %777 = vmatprep.subr.mxu1 %v229_v44 }
  0x1e   :  { %725 = vmatprep.subr.mxu0 %v43_v24  ;;  %778 = vmatpush3.msra.mxu1 %v229_v44 }
  0x1f   :  { %726 = vmatpush3.msra.mxu0 %v43_v24  ;;  %779 = vmatprep.subr.mxu1 %v228_v45 }
  0x20   :  { %727 = vmatprep.subr.mxu0 %v42_v26  ;;  %780 = vmatpush3.msra.mxu1 %v228_v45  ;;  %v413_v45 = vld [vmem:[%s1261_s5 + $0x18] sm:$0xff] }
  0x21   :  { %728 = vmatpush3.msra.mxu0 %v42_v26  ;;  %781 = vmatprep.subr.mxu1 %v227_v46 }
  0x22   :  { %730 = vmatmul.mubr.f32.vlgmr.msra.gmra.mxu0 %v27_v28  ;;  %782 = vmatpush3.msra.mxu1 %v227_v46  ;;  %v412_v46 = vld [vmem:[%s1261_s5 + $0x10] sm:$0xff] }
  0x23   :  { %732 = vmatprep.mubr.f32.mxu0 %v28_v30  ;;  %783 = vmatprep.subr.mxu1 %v226_v47 }
  0x24   :  { %784 = vmatpush3.msra.mxu1 %v226_v47  ;;  %809 = vmatprep.subr.mxu0 %v425_v48  ;;  %v411_v47 = vld [vmem:[%s1261_s5 + $0x8] sm:$0xff] }
  0x25   :  { %865 = vmatprep.subr.mxu1 %v425_v48  ;;  %810 = vmatpush3.msra.mxu0 %v425_v48 }
  0x26   :  { %733 = vmatmul.mubr.f32.gmra.mxu0 %v29_v31  ;;  %811 = vmatprep.subr.mxu0 %v424_v49 }
  0x27   :  { %735 = vmatprep.mubr.f32.mxu0 %v30_v32  ;;  %812 = vmatpush3.msra.mxu0 %v424_v49 }
  0x28   :  { %813 = vmatprep.subr.mxu0 %v423_v50 }
  0x29   :  { %814 = vmatpush3.msra.mxu0 %v423_v50 }
  0x2a   :  { %736 = vmatmul.mubr.f32.gmra.mxu0 %v31_v33  ;;  %815 = vmatprep.subr.mxu0 %v1093_v51 }
  0x2b   :  { %738 = vmatprep.mubr.f32.mxu0 %v32_v34  ;;  %816 = vmatpush3.msra.mxu0 %v1093_v51 }
  0x2c   :  { %817 = vmatprep.subr.mxu0 %v1098_v52 }
  0x2d   :  { %818 = vmatpush3.msra.mxu0 %v1098_v52 }
  0x2e   :  { %739 = vmatmul.mubr.f32.gmra.mxu0 %v33_v35  ;;  %819 = vmatprep.subr.mxu0 %v1105_v53 }
  0x2f   :  { %741 = vmatprep.mubr.f32.mxu0 %v34_v36  ;;  %820 = vmatpush3.msra.mxu0 %v1105_v53 }
  0x30   :  { %821 = vmatprep.subr.mxu0 %v1112_v54 }
  0x31   :  { %822 = vmatpush3.msra.mxu0 %v1112_v54 }
  0x32   :  { %742 = vmatmul.mubr.f32.gmra.mxu0 %v35_v37  ;;  %823 = vmatprep.subr.mxu0 %v1119_v55 }
  0x33   :  { %744 = vmatprep.mubr.f32.mxu0 %v36_v38  ;;  %824 = vmatpush3.msra.mxu0 %v1119_v55 }
  0x34   :  { %825 = vmatprep.subr.mxu0 %v1126_v56 }
  0x35   :  { %826 = vmatpush3.msra.mxu0 %v1126_v56 }
  0x36   :  { %745 = vmatmul.mubr.f32.gmra.mxu0 %v37_v39  ;;  %827 = vmatprep.subr.mxu0 %v1133_v57 }
  0x37   :  { %747 = vmatprep.mubr.f32.mxu0 %v38_v40  ;;  %828 = vmatpush3.msra.mxu0 %v1133_v57 }
  0x38   :  { %829 = vmatprep.subr.mxu0 %v1140_v58 }
  0x39   :  { %830 = vmatpush3.msra.mxu0 %v1140_v58 }
  0x3a   :  { %748 = vmatmul.mubr.f32.gmra.mxu0 %v39_v41  ;;  %831 = vmatprep.subr.mxu0 %v1147_v59 }
  0x3b   :  { %750 = vmatprep.mubr.f32.mxu0 %v40_v42  ;;  %832 = vmatpush3.msra.mxu0 %v1147_v59 }
  0x3c   :  { %833 = vmatprep.subr.mxu0 %v413_v45 }
  0x3d   :  { %834 = vmatpush3.msra.mxu0 %v413_v45 }
  0x3e   :  { %751 = vmatmul.mubr.f32.gmra.mxu0 %v41_v43  ;;  %835 = vmatprep.subr.mxu0 %v412_v46 }
  0x3f   :  { %836 = vmatpush3.msra.mxu0 %v412_v46 }
  0x40   :  { %837 = vmatprep.subr.mxu0 %v411_v47 }
  0x41   :  { %838 = vmatpush3.msra.mxu0 %v411_v47 }
  0xe2   :  { %v731_v61 = vpop.f32.mrf.mxu0 }
  0xe3   :  { %v137_v62 = vadd.f32 %v731_v61, %v1156_v60 }
  0xe4   :  { %v131_v63 = vpop.f32.mrf.mxu0 }
  0xe5   :  { %v132_v0 = vadd.f32 %v1156_v60, %v131_v63  ;;  %v211_v3 = vmax.f32 %v137_v62, 0.0 }
  0xe6   :  { %v734_v1 = vpop.f32.mrf.mxu0 }
  0xe7   :  { %v210_v2 = vmax.f32 %v132_v0, 0.0  ;;  %v147_v4 = vadd.f32 %v734_v1, %v1156_v60 }
  0xe8   :  { %v141_v5 = vpop.f32.mrf.mxu0 }
  0xe9   :  { %v142_v6 = vadd.f32 %v1156_v60, %v141_v5  ;;  %785 = vmatprep.mubr.f32.mxu1 %v210_v2  ;;  %v213_v9 = vmax.f32 %v147_v4, 0.0 }
  0xea   :  { %v737_v7 = vpop.f32.mrf.mxu0  ;;  %786 = vmatmul.mubr.f32.vlgmr.msra.gmra.mxu1 %v211_v3 }
  0xeb   :  { %v212_v8 = vmax.f32 %v142_v6, 0.0  ;;  %881 = vmatpush3.msra.mxu1 %v425_v48  ;;  %v157_v10 = vadd.f32 %v737_v7, %v1156_v60  ;;  %v410_v48 = vld [vmem:[%s1261_s5] sm:$0xff] }
  0xec   :  { %v151_v11 = vpop.f32.mrf.mxu0  ;;  %866 = vmatprep.subr.mxu1 %v424_v49  ;;  %839 = vmatprep.subr.mxu0 %v410_v48 }
  0xed   :  { %v152_v12 = vadd.f32 %v1156_v60, %v151_v11  ;;  %788 = vmatprep.mubr.f32.mxu1 %v212_v8  ;;  %882 = vmatpush3.msra.mxu1 %v424_v49  ;;  %v215_v15 = vmax.f32 %v157_v10, 0.0  ;;  %v599_v49 = vld [vmem:[%s1263_s4] ss:$0 sm:$0xff] }
  0xee   :  { %v740_v13 = vpop.f32.mrf.mxu0  ;;  %789 = vmatmul.mubr.f32.gmra.mxu1 %v213_v9  ;;  %867 = vmatprep.subr.mxu1 %v423_v50 }
  0xef   :  { %v214_v14 = vmax.f32 %v152_v12, 0.0  ;;  %883 = vmatpush3.msra.mxu1 %v423_v50  ;;  %v167_v16 = vadd.f32 %v740_v13, %v1156_v60  ;;  %840 = vmatpush3.msra.mxu0 %v410_v48 }
  0xf0   :  { %v161_v17 = vpop.f32.mrf.mxu0  ;;  %868 = vmatprep.subr.mxu1 %v1093_v51 }
  0xf1   :  { %v162_v18 = vadd.f32 %v1156_v60, %v161_v17  ;;  %791 = vmatprep.mubr.f32.mxu1 %v214_v14  ;;  %884 = vmatpush3.msra.mxu1 %v1093_v51  ;;  %v217_v21 = vmax.f32 %v167_v16, 0.0 }
  0xf2   :  { %v743_v19 = vpop.f32.mrf.mxu0  ;;  %792 = vmatmul.mubr.f32.gmra.mxu1 %v215_v15  ;;  %869 = vmatprep.subr.mxu1 %v1098_v52 }
  0xf3   :  { %v216_v20 = vmax.f32 %v162_v18, 0.0  ;;  %885 = vmatpush3.msra.mxu1 %v1098_v52  ;;  %v177_v22 = vadd.f32 %v743_v19, %v1156_v60 }
  0xf4   :  { %v171_v23 = vpop.f32.mrf.mxu0  ;;  %870 = vmatprep.subr.mxu1 %v1105_v53 }
  0xf5   :  { %v172_v24 = vadd.f32 %v1156_v60, %v171_v23  ;;  %794 = vmatprep.mubr.f32.mxu1 %v216_v20  ;;  %886 = vmatpush3.msra.mxu1 %v1105_v53  ;;  %v219_v27 = vmax.f32 %v177_v22, 0.0 }
  0xf6   :  { %v746_v25 = vpop.f32.mrf.mxu0  ;;  %795 = vmatmul.mubr.f32.gmra.mxu1 %v217_v21  ;;  %871 = vmatprep.subr.mxu1 %v1112_v54 }
  0xf7   :  { %v218_v26 = vmax.f32 %v172_v24, 0.0  ;;  %887 = vmatpush3.msra.mxu1 %v1112_v54  ;;  %v187_v28 = vadd.f32 %v746_v25, %v1156_v60 }
  0xf8   :  { %v181_v29 = vpop.f32.mrf.mxu0  ;;  %872 = vmatprep.subr.mxu1 %v1119_v55 }
  0xf9   :  { %v182_v30 = vadd.f32 %v1156_v60, %v181_v29  ;;  %797 = vmatprep.mubr.f32.mxu1 %v218_v26  ;;  %888 = vmatpush3.msra.mxu1 %v1119_v55  ;;  %v221_v33 = vmax.f32 %v187_v28, 0.0 }
  0xfa   :  { %v749_v31 = vpop.f32.mrf.mxu0  ;;  %798 = vmatmul.mubr.f32.gmra.mxu1 %v219_v27  ;;  %873 = vmatprep.subr.mxu1 %v1126_v56 }
  0xfb   :  { %v220_v32 = vmax.f32 %v182_v30, 0.0  ;;  %889 = vmatpush3.msra.mxu1 %v1126_v56  ;;  %v197_v34 = vadd.f32 %v749_v31, %v1156_v60 }
  0xfc   :  { %v191_v35 = vpop.f32.mrf.mxu0  ;;  %874 = vmatprep.subr.mxu1 %v1133_v57 }
  0xfd   :  { %v192_v36 = vadd.f32 %v1156_v60, %v191_v35  ;;  %800 = vmatprep.mubr.f32.mxu1 %v220_v32  ;;  %890 = vmatpush3.msra.mxu1 %v1133_v57  ;;  %v223_v39 = vmax.f32 %v197_v34, 0.0  ;;  %v600_v34 = vld [vmem:[%s1264_s6] ss:$0 sm:$0xff] }
  0xfe   :  { %v752_v37 = vpop.f32.mrf.mxu0  ;;  %801 = vmatmul.mubr.f32.gmra.mxu1 %v221_v33  ;;  %875 = vmatprep.subr.mxu1 %v1140_v58 }
  0xff   :  { %v222_v38 = vmax.f32 %v192_v36, 0.0  ;;  %891 = vmatpush3.msra.mxu1 %v1140_v58  ;;  %v207_v40 = vadd.f32 %v752_v37, %v1156_v60 }
 0x100   :  { %v201_v41 = vpop.f32.mrf.mxu0  ;;  %876 = vmatprep.subr.mxu1 %v1147_v59 }
 0x101   :  { %v202_v42 = vadd.f32 %v1156_v60, %v201_v41  ;;  %803 = vmatprep.mubr.f32.mxu1 %v222_v38  ;;  %892 = vmatpush3.msra.mxu1 %v1147_v59  ;;  %v225_v44 = vmax.f32 %v207_v40, 0.0 }
 0x102   :  { %804 = vmatmul.mubr.f32.gmra.mxu1 %v223_v39  ;;  %877 = vmatprep.subr.mxu1 %v413_v45 }
 0x103   :  { %v224_v43 = vmax.f32 %v202_v42, 0.0  ;;  %893 = vmatpush3.msra.mxu1 %v413_v45 }
 0x104   :  { %878 = vmatprep.subr.mxu1 %v412_v46 }
 0x105   :  { %806 = vmatprep.mubr.f32.mxu1 %v224_v43  ;;  %894 = vmatpush3.msra.mxu1 %v412_v46 }
 0x106   :  { %807 = vmatmul.mubr.f32.gmra.mxu1 %v225_v44  ;;  %879 = vmatprep.subr.mxu1 %v411_v47 }
 0x107   :  { %895 = vmatpush3.msra.mxu1 %v411_v47 }
 0x108   :  { %880 = vmatprep.subr.mxu1 %v410_v48 }
 0x109   :  { %896 = vmatpush3.msra.mxu1 %v410_v48 }
 0x1aa   :  { %v787_v50 = vpop.f32.mrf.mxu1 }
 0x1ab   :  { %v321_v51 = vadd.f32 %v787_v50, %v599_v49 }
 0x1ac   :  { %v315_v52 = vpop.f32.mrf.mxu1 }
 0x1ad   :  { %v316_v53 = vadd.f32 %v599_v49, %v315_v52  ;;  %v395_v56 = vmax.f32 %v321_v51, 0.0 }
 0x1ae   :  { %v790_v54 = vpop.f32.mrf.mxu1 }
 0x1af   :  { %v394_v55 = vmax.f32 %v316_v53, 0.0  ;;  %v331_v57 = vadd.f32 %v790_v54, %v599_v49 }
 0x1b0   :  { %v325_v58 = vpop.f32.mrf.mxu1 }
 0x1b1   :  { %v326_v59 = vadd.f32 %v599_v49, %v325_v58  ;;  %841 = vmatprep.mubr.f32.mxu0 %v394_v55  ;;  %v397_v62 = vmax.f32 %v331_v57, 0.0 }
 0x1b2   :  { %v793_v60 = vpop.f32.mrf.mxu1  ;;  %842 = vmatmul.mubr.f32.vlgmr.msra.gmra.mxu0 %v395_v56 }
 0x1b3   :  { %v396_v61 = vmax.f32 %v326_v59, 0.0  ;;  %v341_v63 = vadd.f32 %v793_v60, %v599_v49 }
 0x1b4   :  { %v335_v0 = vpop.f32.mrf.mxu1 }
 0x1b5   :  { %v336_v1 = vadd.f32 %v599_v49, %v335_v0  ;;  %844 = vmatprep.mubr.f32.mxu0 %v396_v61  ;;  %v399_v4 = vmax.f32 %v341_v63, 0.0 }
 0x1b6   :  { %v796_v2 = vpop.f32.mrf.mxu1  ;;  %845 = vmatmul.mubr.f32.gmra.mxu0 %v397_v62 }
 0x1b7   :  { %v398_v3 = vmax.f32 %v336_v1, 0.0  ;;  %v351_v5 = vadd.f32 %v796_v2, %v599_v49 }
 0x1b8   :  { %v345_v6 = vpop.f32.mrf.mxu1 }
 0x1b9   :  { %v346_v7 = vadd.f32 %v599_v49, %v345_v6  ;;  %847 = vmatprep.mubr.f32.mxu0 %v398_v3  ;;  %v401_v10 = vmax.f32 %v351_v5, 0.0 }
 0x1ba   :  { %v799_v8 = vpop.f32.mrf.mxu1  ;;  %848 = vmatmul.mubr.f32.gmra.mxu0 %v399_v4 }
 0x1bb   :  { %v400_v9 = vmax.f32 %v346_v7, 0.0  ;;  %v361_v11 = vadd.f32 %v799_v8, %v599_v49 }
 0x1bc   :  { %v355_v12 = vpop.f32.mrf.mxu1 }
 0x1bd   :  { %v356_v13 = vadd.f32 %v599_v49, %v355_v12  ;;  %850 = vmatprep.mubr.f32.mxu0 %v400_v9  ;;  %v403_v16 = vmax.f32 %v361_v11, 0.0 }
 0x1be   :  { %v802_v14 = vpop.f32.mrf.mxu1  ;;  %851 = vmatmul.mubr.f32.gmra.mxu0 %v401_v10 }
 0x1bf   :  { %v402_v15 = vmax.f32 %v356_v13, 0.0  ;;  %v371_v17 = vadd.f32 %v802_v14, %v599_v49 }
 0x1c0   :  { %v365_v18 = vpop.f32.mrf.mxu1 }
 0x1c1   :  { %v366_v19 = vadd.f32 %v599_v49, %v365_v18  ;;  %853 = vmatprep.mubr.f32.mxu1 %v402_v15  ;;  %v405_v22 = vmax.f32 %v371_v17, 0.0 }
 0x1c2   :  { %v805_v20 = vpop.f32.mrf.mxu1  ;;  %854 = vmatmul.mubr.f32.vlgmr.msra.gmra.mxu1 %v403_v16 }
 0x1c3   :  { %v404_v21 = vmax.f32 %v366_v19, 0.0  ;;  %v381_v23 = vadd.f32 %v805_v20, %v599_v49 }
 0x1c4   :  { %v375_v24 = vpop.f32.mrf.mxu1 }
 0x1c5   :  { %v376_v25 = vadd.f32 %v599_v49, %v375_v24  ;;  %856 = vmatprep.mubr.f32.mxu1 %v404_v21  ;;  %v407_v28 = vmax.f32 %v381_v23, 0.0 }
 0x1c6   :  { %v808_v26 = vpop.f32.mrf.mxu1  ;;  %857 = vmatmul.mubr.f32.gmra.mxu1 %v405_v22 }
 0x1c7   :  { %v406_v27 = vmax.f32 %v376_v25, 0.0  ;;  %v391_v29 = vadd.f32 %v808_v26, %v599_v49 }
 0x1c8   :  { %v385_v30 = vpop.f32.mrf.mxu1 }
 0x1c9   :  { %v386_v31 = vadd.f32 %v599_v49, %v385_v30  ;;  %859 = vmatprep.mubr.f32.mxu1 %v406_v27  ;;  %v409_v33 = vmax.f32 %v391_v29, 0.0 }
 0x1ca   :  { %860 = vmatmul.mubr.f32.gmra.mxu1 %v407_v28 }
 0x1cb   :  { %v408_v32 = vmax.f32 %v386_v31, 0.0 }
 0x1cd   :  { %862 = vmatprep.mubr.f32.mxu1 %v408_v32 }
 0x1ce   :  { %863 = vmatmul.mubr.f32.gmra.mxu1 %v409_v33 }
 0x272   :  { %v843_v35 = vpop.f32.mrf.mxu0 }
 0x273   :  { %v505_v36 = vadd.f32 %v843_v35, %v600_v34 }
 0x274   :  { %v499_v37 = vpop.f32.mrf.mxu0 }
 0x275   :  { %579 = vst [vmem:[%s1265_s7 + $0x8] sm:$0xff] %v505_v36  ;;  %v500_v38 = vadd.f32 %v600_v34, %v499_v37 }
 0x276   :  { %v846_v39 = vpop.f32.mrf.mxu0 }
 0x277   :  { %578 = vst [vmem:[%s1265_s7] sm:$0xff] %v500_v38  ;;  %v515_v40 = vadd.f32 %v846_v39, %v600_v34 }
 0x278   :  { %v509_v41 = vpop.f32.mrf.mxu0 }
 0x279   :  { %581 = vst [vmem:[%s1265_s7 + $0x18] sm:$0xff] %v515_v40  ;;  %v510_v42 = vadd.f32 %v600_v34, %v509_v41 }
 0x27a   :  { %v849_v43 = vpop.f32.mrf.mxu0 }
 0x27b   :  { %580 = vst [vmem:[%s1265_s7 + $0x10] sm:$0xff] %v510_v42  ;;  %v525_v44 = vadd.f32 %v849_v43, %v600_v34 }
 0x27c   :  { %v519_v45 = vpop.f32.mrf.mxu0 }
 0x27d   :  { %583 = vst [vmem:[%s1265_s7 + $0x28] sm:$0xff] %v525_v44  ;;  %v520_v46 = vadd.f32 %v600_v34, %v519_v45 }
 0x27e   :  { %v852_v47 = vpop.f32.mrf.mxu0 }
 0x27f   :  { %582 = vst [vmem:[%s1265_s7 + $0x20] sm:$0xff] %v520_v46  ;;  %v535_v48 = vadd.f32 %v852_v47, %v600_v34 }
 0x280   :  { %v529_v49 = vpop.f32.mrf.mxu0 }
 0x281   :  { %585 = vst [vmem:[%s1265_s7 + $0x38] sm:$0xff] %v535_v48  ;;  %v530_v50 = vadd.f32 %v600_v34, %v529_v49 }
 0x282   :  { %v855_v51 = vpop.f32.mrf.mxu1 }
 0x283   :  { %584 = vst [vmem:[%s1265_s7 + $0x30] sm:$0xff] %v530_v50  ;;  %v545_v52 = vadd.f32 %v855_v51, %v600_v34 }
 0x284   :  { %v539_v53 = vpop.f32.mrf.mxu1 }
 0x285   :  { %587 = vst [vmem:[%s1265_s7 + $0x48] sm:$0xff] %v545_v52  ;;  %v540_v54 = vadd.f32 %v600_v34, %v539_v53 }
 0x286   :  { %v858_v55 = vpop.f32.mrf.mxu1 }
 0x287   :  { %586 = vst [vmem:[%s1265_s7 + $0x40] sm:$0xff] %v540_v54  ;;  %v555_v56 = vadd.f32 %v858_v55, %v600_v34 }
 0x288   :  { %v549_v57 = vpop.f32.mrf.mxu1 }
 0x289   :  { %589 = vst [vmem:[%s1265_s7 + $0x58] sm:$0xff] %v555_v56  ;;  %v550_v58 = vadd.f32 %v600_v34, %v549_v57 }
 0x28a   :  { %v861_v59 = vpop.f32.mrf.mxu1 }
 0x28b   :  { %588 = vst [vmem:[%s1265_s7 + $0x50] sm:$0xff] %v550_v58  ;;  %v565_v60 = vadd.f32 %v861_v59, %v600_v34 }
 0x28c   :  { %v559_v61 = vpop.f32.mrf.mxu1 }
 0x28d   :  { %591 = vst [vmem:[%s1265_s7 + $0x68] sm:$0xff] %v565_v60  ;;  %v560_v62 = vadd.f32 %v600_v34, %v559_v61 }
 0x28e   :  { %v864_v63 = vpop.f32.mrf.mxu1 }
 0x28f   :  { %590 = vst [vmem:[%s1265_s7 + $0x60] sm:$0xff] %v560_v62  ;;  %v575_v0 = vadd.f32 %v864_v63, %v600_v34 }
 0x290   :  { %v569_v1 = vpop.f32.mrf.mxu1 }
 0x291   :  { %593 = vst [vmem:[%s1265_s7 + $0x78] sm:$0xff] %v575_v0  ;;  %v570_v2 = vadd.f32 %v600_v34, %v569_v1 }
 0x293   :  { %592 = vst [vmem:[%s1265_s7 + $0x70] sm:$0xff] %v570_v2 }

</bundles_post_ra>
